<compile_context>
chip_gen: v7x
topology: tpu7x:2x2x1
jax: 0.10.0
libtpu: 0.0.40
codegen_flags: <defaults>
</compile_context>

<pallas_src>
import functools

import jax
import jax.numpy as jnp
from jax import lax
from jax.experimental import pallas as pl
from jax.experimental.pallas import tpu as pltpu

EPS = 1e-5
LANES = 128                      # lane-dense channel padding target
NEG_BIG = -1e30                  # finite "minus infinity" for masked points (no nan/inf)
MAX_ROWS_PER_TILE = 16384        # cap on tp*N: keeps (tp*N, 128) f32 temporaries ~8 MiB
_VMEM_LIMIT_BYTES = 48 * 1024 * 1024


def _stats_kernel(vox_ref, w_ref, gamma_ref, beta_ref, scale_ref, shift_ref,
                  sum_ref, sq_ref, *, inv_count):
    """Phase 1: accumulate per-channel sum / sum-sq of y = x @ W across pillar
    tiles (reductions on the MXU), then fold BatchNorm(+affine) into
    per-channel (scale, shift) on the last tile."""
    i = pl.program_id(0)

    @pl.when(i == 0)
    def _():
        sum_ref[...] = jnp.zeros_like(sum_ref)
        sq_ref[...] = jnp.zeros_like(sq_ref)

    vox = vox_ref[...]                                    # (tp, N, C)
    tp, n, c = vox.shape
    x = vox.reshape(tp * n, c)                            # tile-aligned (N % 8 == 0) -> free
    y = jnp.dot(x, w_ref[...], preferred_element_type=jnp.float32)   # (R, 128) on MXU

    # Column reductions on the MXU (separate issue slot -> effectively free while
    # the VPU is the bottleneck): every row of ones @ y equals the column sum.
    ones = jnp.ones((8, tp * n), dtype=jnp.float32)
    sum_ref[...] += jnp.dot(ones, y, preferred_element_type=jnp.float32)      # (8, 128)
    sq_ref[...] += jnp.dot(ones, y * y, preferred_element_type=jnp.float32)   # (8, 128)

    @pl.when(i == pl.num_programs(0) - 1)
    def _():
        mean = sum_ref[0:1, :] * inv_count
        # One-pass biased variance; clamp tiny negative rounding residue.
        var = jnp.maximum(sq_ref[0:1, :] * inv_count - mean * mean, 0.0)
        scale = gamma_ref[...] * lax.rsqrt(var + EPS)
        scale_ref[...] = scale
        shift_ref[...] = beta_ref[...] - mean * scale


def _apply_kernel(vox_ref, w_ref, scale_ref, shift_ref, out_ref):
    """Phase 2: y = x @ (W*scale); masked max over points; shift + ReLU after max."""
    vox = vox_ref[...]                                    # (tp, N, C)
    tp, n, c = vox.shape
    # Reference semantics: a point is "real" iff its first feature != 0.
    mask = vox[:, :, 0:1] != 0.0                          # (tp, N, 1)

    ws = w_ref[...] * scale_ref[...]                      # fold BN scale into the weight
    y = jnp.dot(vox.reshape(tp * n, c), ws,               # tile-aligned reshape
                preferred_element_type=jnp.float32)       # (tp*N, 128)
    y = y.reshape(tp, n, LANES)
    y = jnp.where(mask, y, NEG_BIG)                       # padded points can never win
    m = jnp.max(y, axis=1)                                # (tp, 128)
    # shift-add + ReLU commute with the max (shift constant over points, ReLU
    # monotone); fully-masked pillars give relu(-BIG + shift) == 0 as required.
    out_ref[...] = jnp.maximum(m + shift_ref[...], 0.0)


def pillar_feature_net(voxels, num_points, w, gamma, beta, *, tile_pillars=1024):
    """voxels: (P, N, C); w: (C, Cout) == nn.Linear weight transposed;
    gamma/beta: BatchNorm affine params, shape (Cout,) or (1, Cout)."""
    del num_points  # reference forward derives the mask from voxels[:, :, 0] != 0
    P, N, C = voxels.shape
    Cout = w.shape[1]
    if N % 8 != 0:
        raise ValueError("points-per-pillar N must be a multiple of 8")
    if Cout > LANES:
        raise ValueError("Cout > 128 not supported by this kernel")

    # Pillar tile: multiple of 8 (sublane granularity of the output tile),
    # capped so the (tp*N, 128) f32 in-tile temporaries stay VMEM-friendly.
    tp = min(int(tile_pillars), max(8, MAX_ROWS_PER_TILE // N), pl.cdiv(P, 8) * 8)
    tp = max(8, (tp // 8) * 8)
    P_pad = pl.cdiv(P, tp) * tp
    n_tiles = P_pad // tp

    f32 = jnp.float32
    vox3 = jnp.pad(voxels.astype(f32), ((0, P_pad - P), (0, 0), (0, 0)))
    w_p = jnp.pad(w.astype(f32), ((0, 0), (0, LANES - Cout)))
    gamma_p = jnp.pad(jnp.reshape(gamma, (1, Cout)).astype(f32),
                      ((0, 0), (0, LANES - Cout)))
    beta_p = jnp.pad(jnp.reshape(beta, (1, Cout)).astype(f32),
                     ((0, 0), (0, LANES - Cout)))

    # Padded pillar rows are all-zero -> contribute 0 to both sums, so dividing
    # by the true P*N reproduces the reference BN statistics exactly.
    inv_count = 1.0 / float(P * N)

    vox_spec = pl.BlockSpec((tp, N, C), lambda i: (i, 0, 0))
    w_spec = pl.BlockSpec((C, LANES), lambda i: (0, 0))
    chan_spec = pl.BlockSpec((1, LANES), lambda i: (0, 0))

    flops_mm = 2 * P_pad * N * C * LANES
    stats_cost = pl.CostEstimate(
        flops=int(3 * flops_mm + P_pad * N * LANES),
        transcendentals=0,
        bytes_accessed=int(vox3.size * 4 + w_p.size * 4 + 4 * LANES * 4))
    apply_cost = pl.CostEstimate(
        flops=int(flops_mm + 3 * P_pad * N * LANES),
        transcendentals=0,
        bytes_accessed=int(vox3.size * 4 + w_p.size * 4 + P_pad * LANES * 4))

    # ---- Phase 1: batch statistics -> fused (scale, shift) ----------------
    scale, shift = pl.pallas_call(
        functools.partial(_stats_kernel, inv_count=inv_count),
        grid=(n_tiles,),
        in_specs=[vox_spec, w_spec, chan_spec, chan_spec],
        out_specs=(chan_spec, chan_spec),
        out_shape=(jax.ShapeDtypeStruct((1, LANES), f32),
                   jax.ShapeDtypeStruct((1, LANES), f32)),
        scratch_shapes=[
            pltpu.VMEM((8, LANES), f32),   # running per-channel sum (rows identical)
            pltpu.VMEM((8, LANES), f32),   # running per-channel sum of squares
        ],
        compiler_params=pltpu.CompilerParams(
            dimension_semantics=("arbitrary",),
            vmem_limit_bytes=_VMEM_LIMIT_BYTES),
        cost_estimate=stats_cost,
    )(vox3, w_p, gamma_p, beta_p)

    # ---- Phase 2: fused scale-matmul + masked max + shift + ReLU -----------
    out_pad = pl.pallas_call(
        _apply_kernel,
        grid=(n_tiles,),
        in_specs=[vox_spec, w_spec, chan_spec, chan_spec],
        out_specs=pl.BlockSpec((tp, LANES), lambda i: (i, 0)),
        out_shape=jax.ShapeDtypeStruct((P_pad, LANES), f32),
        compiler_params=pltpu.CompilerParams(
            dimension_semantics=("parallel",),     # megacore-shardable on v7x
            vmem_limit_bytes=_VMEM_LIMIT_BYTES),
        cost_estimate=apply_cost,
    )(vox3, w_p, scale, shift)

    return out_pad[:P, :Cout]


def _reference(voxels, w, gamma, beta):
    """Pure-JAX reference mirroring the PyTorch forward."""
    P, N, C = voxels.shape
    mask = (voxels[:, :, 0] != 0.0).astype(jnp.float32)
    y = voxels.reshape(P * N, C) @ w
    mean = jnp.mean(y, axis=0, keepdims=True)
    var = jnp.mean((y - mean) ** 2, axis=0, keepdims=True)
    y = (y - mean) / jnp.sqrt(var + EPS) * gamma + beta
    y = jnp.maximum(y, 0.0).reshape(P, N, -1) * mask[:, :, None]
    return jnp.max(y, axis=1)


if __name__ == "__main__":
    # Small shapes: P is deliberately NOT a multiple of the pillar tile to
    # exercise the padding path; N is a multiple of 8 (sublane constraint).
    P, N, C, Cout = 60, 16, 4, 64

    key = jax.random.PRNGKey(0)
    k_vox, k_np, k_w, k_g, k_b = jax.random.split(key, 5)

    voxels = jax.random.normal(k_vox, (P, N, C), dtype=jnp.float32)
    # Zero the tail points of each pillar to emulate padding (mask keys off feature 0).
    num_points = jax.random.randint(k_np, (P,), 1, N + 1, dtype=jnp.int32)
    valid = (jnp.arange(N)[None, :] < num_points[:, None]).astype(jnp.float32)
    voxels = voxels * valid[:, :, None]

    # Deterministic parameters (Linear weight.T, BatchNorm affine params).
    w = 0.1 * jax.random.normal(k_w, (C, Cout), dtype=jnp.float32)
    gamma = 1.0 + 0.05 * jax.random.normal(k_g, (Cout,), dtype=jnp.float32)
    beta = 0.05 * jax.random.normal(k_b, (Cout,), dtype=jnp.float32)
    # TODO(synk): BatchNorm running_mean/running_var buffer updates (training-mode
    # side effect) are not modeled; only the forward output is reproduced.

    out = pillar_feature_net(voxels, num_points, w, gamma, beta, tile_pillars=16)
    out = jax.block_until_ready(out)

    ref = _reference(voxels, w, gamma, beta)
    assert out.shape == (P, Cout)
    assert jnp.allclose(out, ref, atol=1e-4, rtol=1e-4), "mismatch vs reference"

    print("KERNEL_OK")
</pallas_src>

<mosaic_0001>
module attributes {stable_mosaic.version = 11 : i64} {
  func.func @_stats_kernel(%arg0: i32, %arg1: memref<16x16x4xf32, #tpu.memory_space<vmem>>, %arg2: memref<4x128xf32, #tpu.memory_space<vmem>>, %arg3: memref<1x128xf32, #tpu.memory_space<vmem>>, %arg4: memref<1x128xf32, #tpu.memory_space<vmem>>, %arg5: memref<1x128xf32, #tpu.memory_space<vmem>>, %arg6: memref<1x128xf32, #tpu.memory_space<vmem>>, %arg7: memref<8x128xf32, #tpu.memory_space<vmem>>, %arg8: memref<8x128xf32, #tpu.memory_space<vmem>>) attributes {dimension_semantics = [#tpu.dimension_semantics<arbitrary>], iteration_bounds = array<i64: 4>, scalar_prefetch = 0 : i64, scratch_operands = 2 : i64, tpu.core_type = #tpu.core_type<tc>, window_params = [{transform_indices = @transform_0, window_bounds = array<i64: 16, 16, 4>}, {pipeline_mode = #tpu.pipeline_mode<synchronous>, transform_indices = @transform_1, window_bounds = array<i64: 4, 128>}, {pipeline_mode = #tpu.pipeline_mode<synchronous>, transform_indices = @transform_2, window_bounds = array<i64: 1, 128>}, {pipeline_mode = #tpu.pipeline_mode<synchronous>, transform_indices = @transform_3, window_bounds = array<i64: 1, 128>}, {pipeline_mode = #tpu.pipeline_mode<synchronous>, transform_indices = @transform_4, window_bounds = array<i64: 1, 128>}, {pipeline_mode = #tpu.pipeline_mode<synchronous>, transform_indices = @transform_5, window_bounds = array<i64: 1, 128>}]} {
    %c0_i32 = arith.constant 0 : i32
    %0 = arith.cmpi eq, %arg0, %c0_i32 : i32
    %1 = arith.extui %0 : i1 to i32
    %c0_i32_0 = arith.constant 0 : i32
    %2 = arith.cmpi ne, %1, %c0_i32_0 : i32
    scf.if %2 {
      %cst_17 = arith.constant 0.000000e+00 : f32
      %20 = vector.broadcast %cst_17 : f32 to vector<8x128xf32>
      %c0_18 = arith.constant 0 : index
      %c0_19 = arith.constant 0 : index
      %21 = vector.load %arg7[%c0_18, %c0_19] : memref<8x128xf32, #tpu.memory_space<vmem>>, vector<8x128xf32>
      tpu.vector_store %arg7[%c0_18, %c0_19], %20 {strides = array<i32>} : memref<8x128xf32, #tpu.memory_space<vmem>>, vector<8x128xf32>,
      %cst_20 = arith.constant 0.000000e+00 : f32
      %22 = vector.broadcast %cst_20 : f32 to vector<8x128xf32>
      %c0_21 = arith.constant 0 : index
      %c0_22 = arith.constant 0 : index
      %23 = vector.load %arg8[%c0_21, %c0_22] : memref<8x128xf32, #tpu.memory_space<vmem>>, vector<8x128xf32>
      tpu.vector_store %arg8[%c0_21, %c0_22], %22 {strides = array<i32>} : memref<8x128xf32, #tpu.memory_space<vmem>>, vector<8x128xf32>,
    } else {
    }
    %c0 = arith.constant 0 : index
    %c0_1 = arith.constant 0 : index
    %c0_2 = arith.constant 0 : index
    %3 = vector.load %arg1[%c0, %c0_1, %c0_2] : memref<16x16x4xf32, #tpu.memory_space<vmem>>, vector<16x16x4xf32>
    %4 = vector.shape_cast %3 : vector<16x16x4xf32> to vector<256x4xf32>
    %c0_3 = arith.constant 0 : index
    %c0_4 = arith.constant 0 : index
    %5 = vector.load %arg2[%c0_3, %c0_4] : memref<4x128xf32, #tpu.memory_space<vmem>>, vector<4x128xf32>
    %cst = arith.constant dense<0.000000e+00> : vector<256x128xf32>
    %6 = tpu.matmul %4, %5, %cst {dimension_numbers = #tpu.dot_dimension_numbers<[1], [0], [0], [1], [0, 0, 1, 1], [], []>} : vector<256x4xf32>, vector<4x128xf32>, vector<256x128xf32> -> vector<256x128xf32>
    %cst_5 = arith.constant 1.000000e+00 : f32
    %7 = vector.broadcast %cst_5 : f32 to vector<8x256xf32>
    %c0_6 = arith.constant 0 : index
    %c0_7 = arith.constant 0 : index
    %8 = vector.load %arg7[%c0_6, %c0_7] : memref<8x128xf32, #tpu.memory_space<vmem>>, vector<8x128xf32>
    %cst_8 = arith.constant dense<0.000000e+00> : vector<8x128xf32>
    %9 = tpu.matmul %7, %6, %cst_8 {dimension_numbers = #tpu.dot_dimension_numbers<[1], [0], [0], [1], [0, 0, 1, 1], [], []>} : vector<8x256xf32>, vector<256x128xf32>, vector<8x128xf32> -> vector<8x128xf32>
    %10 = arith.addf %8, %9 : vector<8x128xf32>
    %c0_9 = arith.constant 0 : index
    %c0_10 = arith.constant 0 : index
    %11 = vector.load %arg7[%c0_9, %c0_10] : memref<8x128xf32, #tpu.memory_space<vmem>>, vector<8x128xf32>
    tpu.vector_store %arg7[%c0_9, %c0_10], %10 {strides = array<i32>} : memref<8x128xf32, #tpu.memory_space<vmem>>, vector<8x128xf32>,
    %c0_11 = arith.constant 0 : index
    %c0_12 = arith.constant 0 : index
    %12 = vector.load %arg8[%c0_11, %c0_12] : memref<8x128xf32, #tpu.memory_space<vmem>>, vector<8x128xf32>
    %13 = arith.mulf %6, %6 : vector<256x128xf32>
    %cst_13 = arith.constant dense<0.000000e+00> : vector<8x128xf32>
    %14 = tpu.matmul %7, %13, %cst_13 {dimension_numbers = #tpu.dot_dimension_numbers<[1], [0], [0], [1], [0, 0, 1, 1], [], []>} : vector<8x256xf32>, vector<256x128xf32>, vector<8x128xf32> -> vector<8x128xf32>
    %15 = arith.addf %12, %14 : vector<8x128xf32>
    %c0_14 = arith.constant 0 : index
    %c0_15 = arith.constant 0 : index
    %16 = vector.load %arg8[%c0_14, %c0_15] : memref<8x128xf32, #tpu.memory_space<vmem>>, vector<8x128xf32>
    tpu.vector_store %arg8[%c0_14, %c0_15], %15 {strides = array<i32>} : memref<8x128xf32, #tpu.memory_space<vmem>>, vector<8x128xf32>,
    %c3_i32 = arith.constant 3 : i32
    %17 = arith.cmpi eq, %arg0, %c3_i32 : i32
    %18 = arith.extui %17 : i1 to i32
    %c0_i32_16 = arith.constant 0 : i32
    %19 = arith.cmpi ne, %18, %c0_i32_16 : i32
    scf.if %19 {
      %c0_17 = arith.constant 0 : index
      %c0_18 = arith.constant 0 : index
      %20 = vector.load %arg7[%c0_17, %c0_18] : memref<8x128xf32, #tpu.memory_space<vmem>>, vector<1x128xf32>
      %cst_19 = arith.constant 0.00104166672 : f32
      %21 = vector.broadcast %cst_19 : f32 to vector<1x128xf32>
      %22 = arith.mulf %20, %21 : vector<1x128xf32>
      %c0_20 = arith.constant 0 : index
      %c0_21 = arith.constant 0 : index
      %23 = vector.load %arg8[%c0_20, %c0_21] : memref<8x128xf32, #tpu.memory_space<vmem>>, vector<1x128xf32>
      %cst_22 = arith.constant 0.00104166672 : f32
      %24 = vector.broadcast %cst_22 : f32 to vector<1x128xf32>
      %25 = arith.mulf %23, %24 : vector<1x128xf32>
      %26 = arith.mulf %22, %22 : vector<1x128xf32>
      %27 = arith.subf %25, %26 : vector<1x128xf32>
      %cst_23 = arith.constant 0.000000e+00 : f32
      %28 = vector.broadcast %cst_23 : f32 to vector<1x128xf32>
      %29 = arith.maximumf %27, %28 : vector<1x128xf32>
      %c0_24 = arith.constant 0 : index
      %c0_25 = arith.constant 0 : index
      %30 = vector.load %arg3[%c0_24, %c0_25] : memref<1x128xf32, #tpu.memory_space<vmem>>, vector<1x128xf32>
      %cst_26 = arith.constant 9.99999974E-6 : f32
      %31 = vector.broadcast %cst_26 : f32 to vector<1x128xf32>
      %32 = arith.addf %29, %31 : vector<1x128xf32>
      %33 = math.rsqrt %32 : vector<1x128xf32>
      %34 = arith.mulf %30, %33 : vector<1x128xf32>
      %c0_27 = arith.constant 0 : index
      %c0_28 = arith.constant 0 : index
      %35 = vector.load %arg5[%c0_27, %c0_28] : memref<1x128xf32, #tpu.memory_space<vmem>>, vector<1x128xf32>
      tpu.vector_store %arg5[%c0_27, %c0_28], %34 {strides = array<i32>} : memref<1x128xf32, #tpu.memory_space<vmem>>, vector<1x128xf32>,
      %c0_29 = arith.constant 0 : index
      %c0_30 = arith.constant 0 : index
      %36 = vector.load %arg4[%c0_29, %c0_30] : memref<1x128xf32, #tpu.memory_space<vmem>>, vector<1x128xf32>
      %37 = arith.mulf %22, %34 : vector<1x128xf32>
      %38 = arith.subf %36, %37 : vector<1x128xf32>
      %c0_31 = arith.constant 0 : index
      %c0_32 = arith.constant 0 : index
      %39 = vector.load %arg6[%c0_31, %c0_32] : memref<1x128xf32, #tpu.memory_space<vmem>>, vector<1x128xf32>
      tpu.vector_store %arg6[%c0_31, %c0_32], %38 {strides = array<i32>} : memref<1x128xf32, #tpu.memory_space<vmem>>, vector<1x128xf32>,
    } else {
    }
    return
  }
  func.func @transform_0(%arg0: i32) -> (i32, i32, i32) {
    %c0_i32 = arith.constant 0 : i32
    %c0_i32_0 = arith.constant 0 : i32
    %c0_i32_1 = arith.constant 0 : i32
    return %arg0, %c0_i32, %c0_i32_0 : i32, i32, i32
  }
  func.func @transform_1(%arg0: i32) -> (i32, i32) {
    %c0_i32 = arith.constant 0 : i32
    %c0_i32_0 = arith.constant 0 : i32
    %c0_i32_1 = arith.constant 0 : i32
    return %c0_i32, %c0_i32_0 : i32, i32
  }
  func.func @transform_2(%arg0: i32) -> (i32, i32) {
    %c0_i32 = arith.constant 0 : i32
    %c0_i32_0 = arith.constant 0 : i32
    %c0_i32_1 = arith.constant 0 : i32
    return %c0_i32, %c0_i32_0 : i32, i32
  }
  func.func @transform_3(%arg0: i32) -> (i32, i32) {
    %c0_i32 = arith.constant 0 : i32
    %c0_i32_0 = arith.constant 0 : i32
    %c0_i32_1 = arith.constant 0 : i32
    return %c0_i32, %c0_i32_0 : i32, i32
  }
  func.func @transform_4(%arg0: i32) -> (i32, i32) {
    %c0_i32 = arith.constant 0 : i32
    %c0_i32_0 = arith.constant 0 : i32
    %c0_i32_1 = arith.constant 0 : i32
    return %c0_i32, %c0_i32_0 : i32, i32
  }
  func.func @transform_5(%arg0: i32) -> (i32, i32) {
    %c0_i32 = arith.constant 0 : i32
    %c0_i32_0 = arith.constant 0 : i32
    %c0_i32_1 = arith.constant 0 : i32
    return %c0_i32, %c0_i32_0 : i32, i32
  }
}

</mosaic_0001>

<bundles_post_ra>
// kernel: tpu_custom_call.1
= control target key start
LH: loop header
LB: loop body
LE: loop exit
PB: predicated region body
PF: predicated region fallthrough
CT: control target
= control target key end

     0   :  { %11 = vsyncpa [#allocation5], 0  ;;  %s1512_s0 = inlined_call_operand.vmem [shape: f32[64,16,4], index: 0, kind: input, shape index: {}]   ;;  %s1513_s1 = inlined_call_operand.vmem [shape: f32[4,128], index: 1, kind: input, shape index: {}]   ;;  %s1514_s2 = inlined_call_operand.vmem [shape: f32[1,128], index: 2, kind: input, shape index: {}]   ;;  %s1515_s3 = inlined_call_operand.vmem [shape: f32[1,128], index: 3, kind: input, shape index: {}]   ;;  %s1516_s4 = inlined_call_operand.hbm [shape: f32[1,128], index: 4, kind: output, shape index: {0}]   ;;  %s1517_s5 = inlined_call_operand.hbm [shape: f32[1,128], index: 5, kind: output, shape index: {1}]  }
   0x1   :  { %12 = vsyncpa [#allocation7], 0  ;;  %s1240_s18 = smov 0  }
   0x2 LB: > { %s1246_s19 = sadd.s32 4294967295, %s1204_s18   ;;  %p849_p0 = scmp.ge.s32.totalorder %s1204_s18, 1  ;;  %s1204_s18 = sphi %s1240_s18, %s18_s18  }
   0x3   : > { %p184_p1 = scmp.lt.s32.totalorder %s1204_s18, 5 }
   0x5   : > { %p185_p2 = pnand %p849_p0, %p184_p1 }
   0x6   : > { %s850_s20 = sshll.u32 (!%p185_p2), %s1246_s19, 4  ;;  %p853_p4 = scmp.ne.s32.totalorder (!%p185_p2), %s1246_s19, 0 }
   0x7   : > { %188 = sbr.rel (%p185_p2) target bundleno = 634 (0x27a), region = 36  ;;  %p209_p3 = scmp.lt.s32.totalorder (!%p185_p2), %s850_s20, 63 }
   0xe   : > { %s1519_s20 = smov (!%p209_p3, %s850_s20), 63  ;;  %218 = sbr.rel (%p853_p4) target bundleno = 21 (0x15), region = 40 }
   0xf   : > { %s894_s21 = sshll.u32 %s1519_s20, 4  ;;  %v1206_v0 = vmov (!%p853_p4), 0.0  }
  0x10   : > { %s1254_s24 = scalar_lea.vmem %s1512_s0, %s894_s21  ;;  %219 = vst [vmem:[#allocation2] sm:$0xff] (!%p853_p4), %v1206_v0  ;;  %220 = vst [vmem:[#allocation3] sm:$0xff] (!%p853_p4), %v1206_v0 }
  0x15 PF: > { %v253_v1 = vld [vmem:[%s1513_s1] sm:$0xf]  ;;  %vm351_vm0 = vcmask 1043456   ;;  %vm254_vm1 = vcmask 31744   ;;  %v222_v3 = vld [vmem:[%s1254_s24 + $0x8] sm:$0xff]  ;;  %v223_v4 = vld [vmem:[%s1254_s24 + $0x10] sm:$0xff] }
  0x16   : > { %v221_v2 = vld [vmem:[%s1254_s24] sm:$0xff]  ;;  %998 = vmatprep.subr.msk.mxu0 %vm351_vm0, %v253_v1  ;;  %v224_v5 = vld [vmem:[%s1254_s24 + $0x18] sm:$0xff]  ;;  %v226_v7 = vld [vmem:[%s1254_s24 + $0x28] sm:$0xff]  ;;  %v1207_v34 = vmov 1.0   ;;  %p887_p5 = scmp.ne.s32.totalorder %s1246_s19, 3 }
  0x17   : > { %1000 = vmatprep.mubr.msk.f32.mxu0 %vm254_vm1, %v221_v2  ;;  %999 = vmatpush3.msk.msra.mxu0 %vm351_vm0, %v253_v1  ;;  %v225_v6 = vld [vmem:[%s1254_s24 + $0x20] sm:$0xff]  ;;  %v227_v8 = vld [vmem:[%s1254_s24 + $0x30] sm:$0xff]  ;;  %v228_v9 = vld [vmem:[%s1254_s24 + $0x38] sm:$0xff] }
  0x18   : > { %1001 = vmatmul.mubr.msk.f32.vlgmr.msra.gmra.mrb[0].mxu0 %vm254_vm1, %v222_v3  ;;  %v229_v10 = vld [vmem:[%s1254_s24 + $0x40] sm:$0xff]  ;;  %v230_v11 = vld [vmem:[%s1254_s24 + $0x48] sm:$0xff]  ;;  %v231_v12 = vld [vmem:[%s1254_s24 + $0x50] sm:$0xff]  ;;  %645 = vmatprep.mubr.f32.mxu1 %v1207_v34 }
  0x19   : > { %1003 = vmatprep.mubr.msk.f32.mxu0 %vm254_vm1, %v223_v4  ;;  %v232_v13 = vld [vmem:[%s1254_s24 + $0x58] sm:$0xff]  ;;  %v233_v14 = vld [vmem:[%s1254_s24 + $0x60] sm:$0xff]  ;;  %v234_v15 = vld [vmem:[%s1254_s24 + $0x68] sm:$0xff] }
  0x1a   : > { %v235_v16 = vld [vmem:[%s1254_s24 + $0x70] sm:$0xff]  ;;  %v236_v17 = vld [vmem:[%s1254_s24 + $0x78] sm:$0xff]  ;;  %v237_v18 = vld [vmem:[%s1254_s24 + $0x80] sm:$0xff] }
  0x1b   : > { %v238_v19 = vld [vmem:[%s1254_s24 + $0x88] sm:$0xff]  ;;  %v239_v20 = vld [vmem:[%s1254_s24 + $0x90] sm:$0xff]  ;;  %v240_v21 = vld [vmem:[%s1254_s24 + $0x98] sm:$0xff] }
  0x1c   : > { %1004 = vmatmul.mubr.msk.f32.gmra.mrb[2].mxu0 %vm254_vm1, %v224_v5  ;;  %v241_v22 = vld [vmem:[%s1254_s24 + $0xa0] sm:$0xff]  ;;  %v242_v23 = vld [vmem:[%s1254_s24 + $0xa8] sm:$0xff]  ;;  %v243_v24 = vld [vmem:[%s1254_s24 + $0xb0] sm:$0xff] }
  0x1d   : > { %1006 = vmatprep.mubr.msk.f32.mxu0 %vm254_vm1, %v225_v6  ;;  %v244_v25 = vld [vmem:[%s1254_s24 + $0xb8] sm:$0xff]  ;;  %v245_v26 = vld [vmem:[%s1254_s24 + $0xc0] sm:$0xff]  ;;  %v246_v27 = vld [vmem:[%s1254_s24 + $0xc8] sm:$0xff] }
  0x1e   : > { %v247_v28 = vld [vmem:[%s1254_s24 + $0xd0] sm:$0xff]  ;;  %v248_v29 = vld [vmem:[%s1254_s24 + $0xd8] sm:$0xff]  ;;  %v249_v30 = vld [vmem:[%s1254_s24 + $0xe0] sm:$0xff] }
  0x1f   : > { %v250_v31 = vld [vmem:[%s1254_s24 + $0xe8] sm:$0xff]  ;;  %v251_v32 = vld [vmem:[%s1254_s24 + $0xf0] sm:$0xff]  ;;  %v252_v33 = vld [vmem:[%s1254_s24 + $0xf8] sm:$0xff] }
  0x20   : > { %1007 = vmatmul.mubr.msk.f32.gmra.mrb[4].mxu0 %vm254_vm1, %v226_v7 }
  0x21   : > { %1009 = vmatprep.mubr.msk.f32.mxu0 %vm254_vm1, %v227_v8 }
  0x24   : > { %1010 = vmatmul.mubr.msk.f32.gmra.mrb[6].mxu0 %vm254_vm1, %v228_v9 }
  0x25   : > { %1012 = vmatprep.mubr.msk.f32.mxu0 %vm254_vm1, %v229_v10 }
  0x28   : > { %1013 = vmatmul.mubr.msk.f32.gmra.mrb[8].mxu0 %vm254_vm1, %v230_v11 }
  0x29   : > { %1015 = vmatprep.mubr.msk.f32.mxu0 %vm254_vm1, %v231_v12 }
  0x2c   : > { %1016 = vmatmul.mubr.msk.f32.gmra.mrb[10].mxu0 %vm254_vm1, %v232_v13 }
  0x2d   : > { %1018 = vmatprep.mubr.msk.f32.mxu0 %vm254_vm1, %v233_v14 }
  0x30   : > { %1019 = vmatmul.mubr.msk.f32.gmra.mrb[12].mxu0 %vm254_vm1, %v234_v15 }
  0x31   : > { %1021 = vmatprep.mubr.msk.f32.mxu0 %vm254_vm1, %v235_v16 }
  0x34   : > { %1022 = vmatmul.mubr.msk.f32.gmra.mrb[14].mxu0 %vm254_vm1, %v236_v17 }
  0x35   : > { %1024 = vmatprep.mubr.msk.f32.mxu0 %vm254_vm1, %v237_v18 }
  0x38   : > { %1025 = vmatmul.mubr.msk.f32.gmra.mrb[16].mxu0 %vm254_vm1, %v238_v19 }
  0x39   : > { %1027 = vmatprep.mubr.msk.f32.mxu0 %vm254_vm1, %v239_v20 }
  0x3c   : > { %1028 = vmatmul.mubr.msk.f32.gmra.mrb[18].mxu0 %vm254_vm1, %v240_v21 }
  0x3d   : > { %1030 = vmatprep.mubr.msk.f32.mxu0 %vm254_vm1, %v241_v22 }
  0x40   : > { %1031 = vmatmul.mubr.msk.f32.gmra.mrb[20].mxu0 %vm254_vm1, %v242_v23 }
  0x41   : > { %1033 = vmatprep.mubr.msk.f32.mxu0 %vm254_vm1, %v243_v24 }
  0x44   : > { %1034 = vmatmul.mubr.msk.f32.gmra.mrb[22].mxu0 %vm254_vm1, %v244_v25 }
  0x45   : > { %1036 = vmatprep.mubr.msk.f32.mxu0 %vm254_vm1, %v245_v26 }
  0x48   : > { %1037 = vmatmul.mubr.msk.f32.gmra.mrb[24].mxu0 %vm254_vm1, %v246_v27 }
  0x49   : > { %1039 = vmatprep.mubr.msk.f32.mxu0 %vm254_vm1, %v247_v28 }
  0x4c   : > { %1040 = vmatmul.mubr.msk.f32.gmra.mrb[26].mxu0 %vm254_vm1, %v248_v29 }
  0x4d   : > { %1042 = vmatprep.mubr.msk.f32.mxu0 %vm254_vm1, %v249_v30 }
  0x50   : > { %1043 = vmatmul.mubr.msk.f32.gmra.mrb[28].mxu0 %vm254_vm1, %v250_v31 }
  0x51   : > { %1045 = vmatprep.mubr.msk.f32.mxu0 %vm254_vm1, %v251_v32 }
  0x54   : > { %1046 = vmatmul.mubr.msk.f32.gmra.mrb[30].mxu0 %vm254_vm1, %v252_v33 }
  0xeb   : > { %v1002_v35 = vpop.f32.mrb[0].mxu0 }
  0xec   : > { %v1325_v36 = vmul.f32 %v1002_v35, %v1002_v35  ;;  %v421_v37 = vpop.f32.mrb[1].mxu0 }
  0xed   : > { %v1327_v38 = vmul.f32 %v421_v37, %v421_v37  ;;  %v1050_v39 = vpack.c.bf16 %v1002_v35, %v421_v37 }
  0xef   : > { %v1082_v40 = vpack.c.bf16 %v1325_v36, %v1327_v38  ;;  %v1005_v41 = vpop.f32.mrb[2].mxu0  ;;  %v580_v38 = vld [vmem:[#allocation2] sm:$0xff] }
  0xf0   : > { %v1331_v42 = vmul.f32 %v1005_v41, %v1005_v41  ;;  %v431_v43 = vpop.f32.mrb[3].mxu0 }
  0xf1   : > { %v1054_v44 = vpack.c.bf16 %v1005_v41, %v431_v43  ;;  %v1333_v45 = vmul.f32 %v431_v43, %v431_v43 }
  0xf3   : > { %v1086_v46 = vpack.c.bf16 %v1331_v42, %v1333_v45  ;;  %v1008_v47 = vpop.f32.mrb[4].mxu0 }
  0xf4   : > { %v1337_v48 = vmul.f32 %v1008_v47, %v1008_v47  ;;  %v441_v49 = vpop.f32.mrb[5].mxu0 }
  0xf5   : > { %v1058_v50 = vpack.c.bf16 %v1008_v47, %v441_v49  ;;  %v1339_v51 = vmul.f32 %v441_v49, %v441_v49 }
  0xf7   : > { %v1090_v52 = vpack.c.bf16 %v1337_v48, %v1339_v51  ;;  %v1343_v53 = vpop.f32.mrb[6].mxu0  ;;  %v653_v48 = vld [vmem:[#allocation3] sm:$0xff] }
  0xf8   : > { %v1347_v54 = vmul.f32 %v1343_v53, %v1343_v53  ;;  %v451_v55 = vpop.f32.mrb[7].mxu0 }
  0xf9   : > { %v1062_v56 = vpack.c.bf16 %v1343_v53, %v451_v55  ;;  %v1350_v57 = vmul.f32 %v451_v55, %v451_v55 }
  0xfb   : > { %v1094_v58 = vpack.c.bf16 %v1347_v54, %v1350_v57  ;;  %v1354_v59 = vpop.f32.mrb[8].mxu0 }
  0xfc   : > { %v1358_v60 = vmul.f32 %v1354_v59, %v1354_v59  ;;  %v1360_v61 = vpop.f32.mrb[9].mxu0 }
  0xfd   : > { %v1066_v62 = vpack.c.bf16 %v1354_v59, %v1360_v61  ;;  %v1366_v63 = vmul.f32 %v1360_v61, %v1360_v61 }
  0xff   : > { %v1098_v0 = vpack.c.bf16 %v1358_v60, %v1366_v63  ;;  %v1370_v1 = vpop.f32.mrb[10].mxu0 }
 0x100   : > { %v1374_v2 = vmul.f32 %v1370_v1, %v1370_v1  ;;  %v1376_v3 = vpop.f32.mrb[11].mxu0 }
 0x101   : > { %v1070_v4 = vpack.c.bf16 %v1370_v1, %v1376_v3  ;;  %v1382_v5 = vmul.f32 %v1376_v3, %v1376_v3  ;;  %v769_v3 = vld [vmem:[%s1514_s2] sm:$0x1] (!%p887_p5) }
 0x103   : > { %v1102_v6 = vpack.c.bf16 %v1374_v2, %v1382_v5  ;;  %v1386_v7 = vpop.f32.mrb[12].mxu0 }
 0x104   : > { %v1390_v8 = vmul.f32 %v1386_v7, %v1386_v7  ;;  %v1392_v9 = vpop.f32.mrb[13].mxu0 }
 0x105   : > { %v1074_v10 = vpack.c.bf16 %v1386_v7, %v1392_v9  ;;  %v1398_v11 = vmul.f32 %v1392_v9, %v1392_v9 }
 0x107   : > { %v1106_v12 = vpack.c.bf16 %v1390_v8, %v1398_v11  ;;  %v1402_v13 = vpop.f32.mrb[14].mxu0 }
 0x108   : > { %v1406_v14 = vmul.f32 %v1402_v13, %v1402_v13  ;;  %v1408_v15 = vpop.f32.mrb[15].mxu0 }
 0x109   : > { %v1078_v16 = vpack.c.bf16 %v1402_v13, %v1408_v15  ;;  %v1414_v17 = vmul.f32 %v1408_v15, %v1408_v15 }
 0x10b   : > { %v1110_v18 = vpack.c.bf16 %v1406_v14, %v1414_v17  ;;  %v1026_v19 = vpop.f32.mrb[16].mxu0 }
 0x10c   : > { %v1418_v20 = vmul.f32 %v1026_v19, %v1026_v19  ;;  %v501_v21 = vpop.f32.mrb[17].mxu0 }
 0x10d   : > { %v670_v22 = vmul.f32 %v501_v21, %v501_v21  ;;  %v1048_v23 = vpack.c.bf16 %v1026_v19, %v501_v21 }
 0x10f   : > { %v1080_v24 = vpack.c.bf16 %v1418_v20, %v670_v22  ;;  %v1029_v25 = vpop.f32.mrb[18].mxu0  ;;  %1049 = vmatprep.subr.bf16.mxu1 %v1048_v23 }
 0x110   : > { %v673_v26 = vmul.f32 %v1029_v25, %v1029_v25  ;;  %v511_v27 = vpop.f32.mrb[19].mxu0  ;;  %1051 = vmatpush3.bf16.msra.mxu1 %v1050_v39 }
 0x111   : > { %v1052_v28 = vpack.c.bf16 %v1029_v25, %v511_v27  ;;  %v672_v29 = vmul.f32 %v511_v27, %v511_v27 }
 0x113   : > { %v1084_v30 = vpack.c.bf16 %v673_v26, %v672_v29  ;;  %v1032_v31 = vpop.f32.mrb[20].mxu0  ;;  %1053 = vmatprep.subr.bf16.mxu1 %v1052_v28 }
 0x114   : > { %v675_v32 = vmul.f32 %v1032_v31, %v1032_v31  ;;  %v521_v33 = vpop.f32.mrb[21].mxu0  ;;  %1055 = vmatpush3.bf16.msra.mxu1 %v1054_v44 }
 0x115   : > { %v1056_v35 = vpack.c.bf16 %v1032_v31, %v521_v33  ;;  %v674_v37 = vmul.f32 %v521_v33, %v521_v33 }
 0x117   : > { %v1088_v41 = vpack.c.bf16 %v675_v32, %v674_v37  ;;  %v1035_v43 = vpop.f32.mrb[22].mxu0  ;;  %1057 = vmatprep.subr.bf16.mxu1 %v1056_v35 }
 0x118   : > { %v677_v47 = vmul.f32 %v1035_v43, %v1035_v43  ;;  %v531_v49 = vpop.f32.mrb[23].mxu0  ;;  %1059 = vmatpush3.bf16.msra.mxu1 %v1058_v50 }
 0x119   : > { %v1060_v53 = vpack.c.bf16 %v1035_v43, %v531_v49  ;;  %v676_v55 = vmul.f32 %v531_v49, %v531_v49 }
 0x11b   : > { %v1092_v59 = vpack.c.bf16 %v677_v47, %v676_v55  ;;  %v1038_v39 = vpop.f32.mrb[24].mxu0  ;;  %1061 = vmatprep.subr.bf16.mxu1 %v1060_v53 }
 0x11c   : > { %v679_v61 = vmul.f32 %v1038_v39, %v1038_v39  ;;  %v541_v19 = vpop.f32.mrb[25].mxu0  ;;  %1063 = vmatpush3.bf16.msra.mxu1 %v1062_v56 }
 0x11d   : > { %v1064_v20 = vpack.c.bf16 %v1038_v39, %v541_v19  ;;  %v678_v21 = vmul.f32 %v541_v19, %v541_v19 }
 0x11f   : > { %v1096_v22 = vpack.c.bf16 %v679_v61, %v678_v21  ;;  %v1041_v44 = vpop.f32.mrb[26].mxu0  ;;  %1065 = vmatprep.subr.bf16.mxu1 %v1064_v20 }
 0x120   : > { %v681_v23 = vmul.f32 %v1041_v44, %v1041_v44  ;;  %v551_v25 = vpop.f32.mrb[27].mxu0  ;;  %1067 = vmatpush3.bf16.msra.mxu1 %v1066_v62 }
 0x121   : > { %v1068_v26 = vpack.c.bf16 %v1041_v44, %v551_v25  ;;  %v680_v27 = vmul.f32 %v551_v25, %v551_v25 }
 0x123   : > { %v1100_v28 = vpack.c.bf16 %v681_v23, %v680_v27  ;;  %v1044_v50 = vpop.f32.mrb[28].mxu0  ;;  %1069 = vmatprep.subr.bf16.mxu1 %v1068_v26 }
 0x124   : > { %v683_v29 = vmul.f32 %v1044_v50, %v1044_v50  ;;  %v561_v31 = vpop.f32.mrb[29].mxu0  ;;  %1071 = vmatpush3.bf16.msra.mxu1 %v1070_v4 }
 0x125   : > { %v1072_v56 = vpack.c.bf16 %v1044_v50, %v561_v31  ;;  %v682_v32 = vmul.f32 %v561_v31, %v561_v31 }
 0x127   : > { %v1104_v33 = vpack.c.bf16 %v683_v29, %v682_v32  ;;  %v1047_v35 = vpop.f32.mrb[30].mxu0  ;;  %1073 = vmatprep.subr.bf16.mxu1 %v1072_v56 }
 0x128   : > { %v685_v37 = vmul.f32 %v1047_v35, %v1047_v35  ;;  %v571_v43 = vpop.f32.mrb[31].mxu0  ;;  %1075 = vmatpush3.bf16.msra.mxu1 %v1074_v10 }
 0x129   : > { %v1076_v62 = vpack.c.bf16 %v1047_v35, %v571_v43  ;;  %v684_v47 = vmul.f32 %v571_v43, %v571_v43 }
 0x12b   : > { %v1108_v49 = vpack.c.bf16 %v685_v37, %v684_v47  ;;  %1077 = vmatprep.subr.bf16.mxu1 %v1076_v62 }
 0x12c   : > { %1079 = vmatpush3.bf16.msra.mxu1 %v1078_v16 }
 0x12d   : > { %1081 = vmatprep.subr.bf16.mxu1 %v1080_v24 }
 0x12f   : > { %646 = vmatmul.mubr.f32.vlgmr.msra.gmra.mrb[0].mxu1 %v1207_v34 }
 0x130   : > { %1083 = vmatpush3.bf16.msra.mxu1 %v1082_v40  ;;  %750 = vmatprep.mubr.f32.mxu1 %v1207_v34 }
 0x131   : > { %1085 = vmatprep.subr.bf16.mxu1 %v1084_v30 }
 0x134   : > { %1087 = vmatpush3.bf16.msra.mxu1 %v1086_v46 }
 0x135   : > { %1089 = vmatprep.subr.bf16.mxu1 %v1088_v41 }
 0x138   : > { %1091 = vmatpush3.bf16.msra.mxu1 %v1090_v52 }
 0x139   : > { %1093 = vmatprep.subr.bf16.mxu1 %v1092_v59 }
 0x13c   : > { %1095 = vmatpush3.bf16.msra.mxu1 %v1094_v58 }
 0x13d   : > { %1097 = vmatprep.subr.bf16.mxu1 %v1096_v22 }
 0x140   : > { %1099 = vmatpush3.bf16.msra.mxu1 %v1098_v0 }
 0x141   : > { %1101 = vmatprep.subr.bf16.mxu1 %v1100_v28 }
 0x144   : > { %1103 = vmatpush3.bf16.msra.mxu1 %v1102_v6  ;;  %v774_v6 = vld [vmem:[%s1515_s3] sm:$0x1] (!%p887_p5) }
 0x145   : > { %1105 = vmatprep.subr.bf16.mxu1 %v1104_v33 }
 0x148   : > { %1107 = vmatpush3.bf16.msra.mxu1 %v1106_v12 }
 0x149   : > { %1109 = vmatprep.subr.bf16.mxu1 %v1108_v49 }
 0x14c   : > { %1111 = vmatpush3.bf16.msra.mxu1 %v1110_v18 }
 0x14f   : > { %751 = vmatmul.mubr.f32.vlgmr.msra.gmra.mrb[2].mxu1 %v1207_v34 }
 0x202   : > { %v960_v36 = vpop.f32.mrb[0].mxu1 }
 0x203   : > { %v961_v40 = vpop.f32.mrb[1].mxu1 }
 0x204   : > { %v962_v42 = vadd.f32 %v961_v40, %v960_v36 }
 0x206   : > { %v651_v45 = vadd.f32 %v962_v42, %v580_v38 }
 0x208   : > { %652 = vst [vmem:[#allocation2] sm:$0xff] %v651_v45 }
 0x20f   : > { %v762_v57 = vld [vmem:[#allocation2] sm:$0x1] (!%p887_p5) }
 0x210   : > { %v763_v60 = vmul.f32 (!%p887_p5), 0.0010416667, %v762_v57 }
 0x212   : > { %v766_v34 = vmul.f32 (!%p887_p5), %v763_v60, %v763_v60 }
 0x222   : > { %v995_v46 = vpop.f32.mrb[2].mxu1  ;;  %761 = sbr.rel (%p887_p5) target bundleno = 586 (0x24a), region = 44 }
 0x223   : > { %v996_v51 = vpop.f32.mrb[3].mxu1 }
 0x224   : > { %v997_v52 = vadd.f32 %v996_v51, %v995_v46 }
 0x226   : > { %v756_v54 = vadd.f32 %v997_v52, %v653_v48 }
 0x228   : > { %757 = vst [vmem:[#allocation3] sm:$0xff] %v756_v54 }
 0x22f   : > { %v764_v58 = vld [vmem:[#allocation3] sm:$0x1] }
 0x230   : > { %v765_v63 = vmul.f32 0.0010416667, %v764_v58 }
 0x232   : > { %v767_v0 = vsub.f32 %v765_v63, %v766_v34 }
 0x234   : > { %v768_v1 = vmax.f32 %v767_v0, 0.0 }
 0x236   : > { %v770_v2 = vadd.f32 1e-05, %v768_v1 }
 0x238   : > { %1136 = vrsqrt.f32 %v770_v2 }
 0x242   : > { %v1137_v4 = vpop.eup %1136 }
 0x243   : > { %v772_v5 = vmul.f32 %v1137_v4, %v769_v3 }
 0x245   : > { %773 = vst [vmem:[#allocation4] sm:$0x1] %v772_v5  ;;  %v775_v7 = vmul.f32 %v772_v5, %v763_v60 }
 0x247   : > { %v776_v8 = vsub.f32 %v774_v6, %v775_v7 }
 0x249   : > { %777 = vst [vmem:[#allocation6] sm:$0x1] %v776_v8 }
 0x24a PF: > { %p1120_p6 = scmp.eq.s32.totalorder %s1246_s19, 3  ;;  %s1208_s6 = smov [#allocation4]  }
 0x24b   : > { %s785_s7 = sshll.u32 %s1208_s6, 4  ;;  %s1209_s8 = smov [#allocation6]   ;;  %s786_s7 = int_to_ptr.vmem [resolvable:$true] %s785_s7 }
 0x24c   : > { %s796_s9 = sshll.u32 %s1209_s8, 4  ;;  %s1138_s10 = scalar_lea.vmem %s786_s7, 16  ;;  %s797_s9 = int_to_ptr.vmem [resolvable:$true] %s796_s9 }
 0x24d   : > { %p1139_p7 = scmp.ne.s32.totalorder %s786_s7, %s1138_s10  ;;  %s1144_s11 = scalar_lea.vmem %s786_s7, 32 }
 0x24e   : > { %p1145_p10 = scmp.lt.s32.totalorder %s786_s7, %s786_s7  ;;  %p1146_p11 = scmp.lt.s32.totalorder %s1144_s11, %s1138_s10 }
 0x24f   : > { %p1140_p8 = pnand %p1139_p7, %p1120_p6 }
 0x250   : > { %p1147_p12 = por %p1146_p11, %p1145_p10 }
 0x251   : > { %p1141_p9 = pneg %p1140_p8 }
 0x253   : > { %p1148_p13 = pnand %p1147_p12, %p1141_p9 }
 0x255   : > { %1151 = shalt.err (!%p1148_p13)
}
 0x256   : > { %s1152_s14 = scalar_lea.hbm %s1516_s4, 16 }
 0x257   : > { %p1153_p0 = scmp.ne.s32.totalorder %s1516_s4, %s1152_s14  ;;  %p1158_p3 = scmp.lt.u32.totalorder %s1152_s14, %s1516_s4 }
 0x259   : > { %p1154_p1 = pnand %p1153_p0, %p1120_p6 }
 0x25b   : > { %p1155_p2 = pneg %p1154_p1 }
 0x25d   : > { %p1160_p4 = pnand %p1158_p3, %p1155_p2 }
 0x25f   : > { %1163 = shalt.err (!%p1160_p4)
}
 0x260   : > { %1113 = dma.vmem_to_hbm [thread:$0]  (%p1120_p6), %s786_s7, 16, %s1516_s4, [#allocation5]  }
 0x261   : > { %s1164_s23 = scalar_lea.vmem %s797_s9, 16  ;;  %s1170_s24 = scalar_lea.vmem %s797_s9, 32 }
 0x262   : > { %p1165_p5 = scmp.ne.s32.totalorder %s797_s9, %s1164_s23  ;;  %p1171_p9 = scmp.lt.s32.totalorder %s797_s9, %s797_s9 }
 0x263   : > { %p1172_p10 = scmp.lt.s32.totalorder %s1170_s24, %s1164_s23 }
 0x264   : > { %p1166_p7 = pnand %p1165_p5, %p1120_p6 }
 0x265   : > { %p1173_p11 = por %p1172_p10, %p1171_p9 }
 0x266   : > { %p1167_p8 = pneg %p1166_p7 }
 0x268   : > { %p1174_p12 = pnand %p1173_p11, %p1167_p8 }
 0x26a   : > { %1177 = shalt.err (!%p1174_p12)
}
 0x26b   : > { %s1178_s27 = scalar_lea.hbm %s1517_s5, 16 }
 0x26c   : > { %p1179_p13 = scmp.ne.s32.totalorder %s1517_s5, %s1178_s27  ;;  %p1184_p2 = scmp.lt.u32.totalorder %s1178_s27, %s1517_s5 }
 0x26e   : > { %p1180_p0 = pnand %p1179_p13, %p1120_p6 }
 0x270   : > { %p1181_p1 = pneg %p1180_p0 }
 0x272   : > { %p1186_p3 = pnand %p1184_p2, %p1181_p1 }
 0x274   : > { %1189 = shalt.err (!%p1186_p3)
}
 0x275   : > { %1115 = dma.vmem_to_hbm [thread:$0]  (%p1120_p6), %s797_s9, 16, %s1517_s5, [#allocation7]  }
 0x276   : > { %1195 = dma.done.wait (%p1120_p6), [#allocation5], 16  }
 0x277   : > { %1197 = vsyncadd (%p1120_p6), [#allocation5], 4294967280 }
 0x278   : > { %1199 = dma.done.wait (%p1120_p6), [#allocation7], 16  }
 0x279   : > { %1201 = vsyncadd (%p1120_p6), [#allocation7], 4294967280 }
 0x27a PF: > { %s18_s18 = sadd.s32 1, %s1204_s18  }
 0x27b   : > { %p15_p4 = scmp.ge.s32.totalorder %s18_s18, 6  }
 0x27d   :  { %17 = sbr.rel (!%p15_p4) target bundleno = 2 (0x2), region = 79 }
 0x284   :  { %813 = vsyncpa [#allocation5], 1 }
 0x285   :  { %815 = vsyncpa [#allocation5 + $0x1], 1 }
 0x286   :  { %816 = vsyncpa [#allocation7], 1 }

</bundles_post_ra>
